<compile_context>
chip_gen: v7x
topology: tpu7x:2x2x1
jax: 0.10.0
libtpu: 0.0.40
codegen_flags: <defaults>
</compile_context>

<pallas_src>
import numpy as np
import jax
import jax.numpy as jnp
from jax.experimental import pallas as pl
from jax.experimental.pallas import tpu as pltpu


def _round_up(x, m):
    return ((x + m - 1) // m) * m


def time_encode_kernel(ts_ref, w_ref, phase_ref, out_ref):
    # ts_ref:    (TILE_R, K)    f32  -- K packed (zero-padded) time steps per row
    # w_ref:     (K, LANE)      f32  -- block-diagonal basis_freq (resident across grid)
    # phase_ref: (1, LANE)      f32  -- tiled phase (resident across grid)
    # out_ref:   (TILE_R, LANE) out dtype
    arg = jnp.dot(
        ts_ref[...], w_ref[...],
        preferred_element_type=jnp.float32,
        precision=jax.lax.Precision.HIGHEST,  # exact f32 products on the MXU
    )
    out_ref[...] = jnp.cos(arg + phase_ref[...]).astype(out_ref.dtype)


def make_time_encode_params(expand_dim):
    """Deterministic parameter init matching TimeEncode.__init__."""
    basis_freq = (1.0 / 10.0 ** np.linspace(0, 9, expand_dim)).astype(np.float32)
    phase = np.zeros(expand_dim, dtype=np.float32)
    return jnp.asarray(basis_freq), jnp.asarray(phase)


def time_encode(ts, basis_freq, phase, *, tile_rows=1024, out_dtype=jnp.float32):
    """ts: [B, L] -> [B, L, D] (D = basis_freq.shape[0])."""
    B, L = ts.shape
    D = basis_freq.shape[0]
    N = B * L

    # Pack G time steps per output row so the stored last dim is a full 128 lanes.
    if D <= 128 and 128 % D == 0:
        G = 128 // D
    else:
        G = 1  # lane-sparse fallback for awkward D
    lane = G * D
    K = _round_up(G, 8)  # MXU/sublane-friendly contraction dim (zero rows are exact)

    # Row tiling over the packed output; tile_r is a multiple of 8.
    R = -(-N // G)
    tile_r = min(_round_up(tile_rows, 8), _round_up(R, 8))
    R_pad = _round_up(R, tile_r)

    # Pack ts: ts_pack[r, g] = ts_flat[r*G + g], zero padded to (R_pad, K).
    ts_flat = ts.reshape(N).astype(jnp.float32)
    ts_flat = jnp.pad(ts_flat, (0, R_pad * G - N))
    ts_pack = jnp.pad(ts_flat.reshape(R_pad, G), ((0, 0), (0, K - G)))

    # Block-diagonal frequency matrix: W[g, g*D + d] = basis_freq[d]; zero rows pad to K.
    w = jnp.kron(jnp.eye(G, dtype=jnp.float32),
                 basis_freq.reshape(1, D).astype(jnp.float32))
    w = jnp.pad(w, ((0, K - G), (0, 0)))
    phase_t = jnp.tile(phase.astype(jnp.float32), G).reshape(1, lane)

    out_packed = pl.pallas_call(
        time_encode_kernel,
        out_shape=jax.ShapeDtypeStruct((R_pad, lane), out_dtype),
        grid=(R_pad // tile_r,),
        in_specs=[
            pl.BlockSpec((tile_r, K), lambda i: (i, 0)),
            pl.BlockSpec((K, lane), lambda i: (0, 0)),   # stays resident in VMEM
            pl.BlockSpec((1, lane), lambda i: (0, 0)),   # stays resident in VMEM
        ],
        out_specs=pl.BlockSpec((tile_r, lane), lambda i: (i, 0)),
        compiler_params=pltpu.CompilerParams(
            dimension_semantics=("parallel",),           # megacore sharding on v7x
        ),
    )(ts_pack, w, phase_t)

    # Unpack: row r, cols [g*D:(g+1)*D] hold time step r*G + g.
    return out_packed.reshape(R_pad * G, D)[:N].reshape(B, L, D)


if __name__ == "__main__":
    B, L, D = 2, 8, 32  # batch, seq_len, expand_dim (time_dim)

    key = jax.random.PRNGKey(0)
    ts = jax.random.uniform(key, (B, L), dtype=jnp.float32) * 10.0

    basis_freq, phase = make_time_encode_params(D)

    out = jax.block_until_ready(time_encode(ts, basis_freq, phase))

    # Pure-JAX reference (matches the PyTorch forward).
    ref = jnp.cos(ts[:, :, None] * basis_freq[None, None, :] + phase[None, None, :])
    assert out.shape == (B, L, D)
    np.testing.assert_allclose(np.asarray(out), np.asarray(ref), rtol=1e-5, atol=1e-5)

    print("KERNEL_OK")
</pallas_src>

<mosaic_0001>
module attributes {stable_mosaic.version = 11 : i64} {
  func.func @time_encode_kernel(%arg0: i32, %arg1: memref<8x8xf32, #tpu.memory_space<vmem>>, %arg2: memref<8x128xf32, #tpu.memory_space<vmem>>, %arg3: memref<1x128xf32, #tpu.memory_space<vmem>>, %arg4: memref<8x128xf32, #tpu.memory_space<vmem>>) attributes {dimension_semantics = [#tpu.dimension_semantics<parallel>], iteration_bounds = array<i64: 1>, scalar_prefetch = 0 : i64, scratch_operands = 0 : i64, tpu.core_type = #tpu.core_type<tc>, window_params = [{transform_indices = @transform_0, window_bounds = array<i64: 8, 8>}, {pipeline_mode = #tpu.pipeline_mode<synchronous>, transform_indices = @transform_1, window_bounds = array<i64: 8, 128>}, {pipeline_mode = #tpu.pipeline_mode<synchronous>, transform_indices = @transform_2, window_bounds = array<i64: 1, 128>}, {transform_indices = @transform_3, window_bounds = array<i64: 8, 128>}]} {
    %c0 = arith.constant 0 : index
    %c0_0 = arith.constant 0 : index
    %0 = vector.load %arg1[%c0, %c0_0] : memref<8x8xf32, #tpu.memory_space<vmem>>, vector<8x8xf32>
    %c0_1 = arith.constant 0 : index
    %c0_2 = arith.constant 0 : index
    %1 = vector.load %arg2[%c0_1, %c0_2] : memref<8x128xf32, #tpu.memory_space<vmem>>, vector<8x128xf32>
    %cst = arith.constant dense<0.000000e+00> : vector<8x128xf32>
    %2 = tpu.matmul %0, %1, %cst {dimension_numbers = #tpu.dot_dimension_numbers<[1], [0], [0], [1], [0, 0, 1, 1], [], []>, precision = #tpu.contract_precision<fp32>} : vector<8x8xf32>, vector<8x128xf32>, vector<8x128xf32> -> vector<8x128xf32>
    %c0_3 = arith.constant 0 : index
    %c0_4 = arith.constant 0 : index
    %3 = vector.load %arg3[%c0_3, %c0_4] : memref<1x128xf32, #tpu.memory_space<vmem>>, vector<1x128xf32>
    %4 = vector.broadcast %3 : vector<1x128xf32> to vector<8x128xf32>
    %5 = arith.addf %2, %4 : vector<8x128xf32>
    %6 = math.cos %5 : vector<8x128xf32>
    %c0_5 = arith.constant 0 : index
    %c0_6 = arith.constant 0 : index
    %7 = vector.load %arg4[%c0_5, %c0_6] : memref<8x128xf32, #tpu.memory_space<vmem>>, vector<8x128xf32>
    tpu.vector_store %arg4[%c0_5, %c0_6], %6 {strides = array<i32>} : memref<8x128xf32, #tpu.memory_space<vmem>>, vector<8x128xf32>,
    return
  }
  func.func @transform_0(%arg0: i32) -> (i32, i32) {
    %c0_i32 = arith.constant 0 : i32
    %c0_i32_0 = arith.constant 0 : i32
    return %arg0, %c0_i32 : i32, i32
  }
  func.func @transform_1(%arg0: i32) -> (i32, i32) {
    %c0_i32 = arith.constant 0 : i32
    %c0_i32_0 = arith.constant 0 : i32
    %c0_i32_1 = arith.constant 0 : i32
    return %c0_i32, %c0_i32_0 : i32, i32
  }
  func.func @transform_2(%arg0: i32) -> (i32, i32) {
    %c0_i32 = arith.constant 0 : i32
    %c0_i32_0 = arith.constant 0 : i32
    %c0_i32_1 = arith.constant 0 : i32
    return %c0_i32, %c0_i32_0 : i32, i32
  }
  func.func @transform_3(%arg0: i32) -> (i32, i32) {
    %c0_i32 = arith.constant 0 : i32
    %c0_i32_0 = arith.constant 0 : i32
    return %arg0, %c0_i32 : i32, i32
  }
}

</mosaic_0001>

<bundles_post_ra>
// kernel: tpu_custom_call.1
= control target key start
LH: loop header
LB: loop body
LE: loop exit
PB: predicated region body
PF: predicated region fallthrough
CT: control target
= control target key end

     0   :  { %8 = vsyncpa [#allocation3], 0  ;;  %s863_s0 = inlined_call_operand.hbm [shape: f32[8,8], index: 0, kind: input, shape index: {}]   ;;  %s864_s1 = inlined_call_operand.hbm [shape: f32[8,128], index: 1, kind: input, shape index: {}]   ;;  %s865_s2 = inlined_call_operand.vmem [shape: f32[1,128], index: 2, kind: input, shape index: {}]   ;;  %s866_s3 = inlined_call_operand.hbm [shape: f32[8,128], index: 3, kind: output, shape index: {}]  }
   0x1   :  { %9 = vsyncpa [#allocation6], 0 }
   0x2   :  { %10 = vsyncpa [#allocation4], 0  ;;  %s766_s12 = smov [#allocation2]   ;;  %s767_s14 = smov [#allocation5]  }
   0x3   :  { %s17_s13 = sshll.u32 %s766_s12, 4  ;;  %s27_s15 = sshll.u32 %s767_s14, 4  ;;  %s18_s13 = int_to_ptr.vmem [resolvable:$true] %s17_s13  ;;  %s28_s15 = int_to_ptr.vmem [resolvable:$true] %s27_s15 }
   0x4   :  { %s694_s18 = scalar_lea.hbm %s863_s0, 128 }
   0x5   :  { %p695_p0 = scmp.ne.s32.totalorder %s863_s0, %s694_s18  ;;  %p698_p1 = scmp.lt.u32.totalorder %s694_s18, %s863_s0 }
   0x7   :  { %p700_p2 = pnand %p698_p1, %p695_p0 }
   0x9   :  { %703 = shalt.err (!%p700_p2)
}
   0xa   :  { %s704_s23 = scalar_lea.vmem %s18_s13, 128  ;;  %p709_p4 = scmp.lt.s32.totalorder %s18_s13, %s18_s13 }
   0xb   :  { %p705_p3 = scmp.ne.s32.totalorder %s18_s13, %s704_s23  ;;  %p710_p5 = scmp.lt.s32.totalorder %s704_s23, %s704_s23 }
   0xd   :  { %p711_p6 = por %p710_p5, %p709_p4 }
   0xf   :  { %p712_p7 = pnand %p711_p6, %p705_p3 }
  0x11   :  { %715 = shalt.err (!%p712_p7)
}
  0x12   :  { %20 = dma.hbm_to_vmem [thread:$0]  %s863_s0, 128, %s18_s13, [#allocation3]  }
  0x13   :  { %s716_s28 = scalar_lea.hbm %s864_s1, 128 }
  0x14   :  { %p717_p8 = scmp.ne.s32.totalorder %s864_s1, %s716_s28  ;;  %p720_p9 = scmp.lt.u32.totalorder %s716_s28, %s864_s1 }
  0x16   :  { %p722_p10 = pnand %p720_p9, %p717_p8 }
  0x18   :  { %725 = shalt.err (!%p722_p10)
}
  0x19   :  { %s726_s6 = scalar_lea.vmem %s28_s15, 128  ;;  %p731_p12 = scmp.lt.s32.totalorder %s28_s15, %s28_s15 }
  0x1a   :  { %p727_p11 = scmp.ne.s32.totalorder %s28_s15, %s726_s6  ;;  %p732_p13 = scmp.lt.s32.totalorder %s726_s6, %s726_s6 }
  0x1c   :  { %p733_p0 = por %p732_p13, %p731_p12 }
  0x1e   :  { %p734_p1 = pnand %p733_p0, %p727_p11 }
  0x20   :  { %737 = shalt.err (!%p734_p1)
}
  0x21   :  { %30 = dma.hbm_to_vmem [thread:$0]  %s864_s1, 128, %s28_s15, [#allocation6]  }
  0x22   :  { %760 = dma.done.wait [#allocation3], 128  }
  0x23   :  { %761 = vsyncadd [#allocation3], 4294967168 }
  0x24   :  { %762 = dma.done.wait [#allocation6], 128  }
  0x25   :  { %763 = vsyncadd [#allocation6], 4294967168  ;;  %v768_v0 = vmov 0.0   ;;  %vm769_vm0 = vmmov 0   ;;  %vm48_vm1 = vcmask 64512   ;;  %v40_v1 = vld [vmem:[#allocation5] sm:$0xff] }
  0x26   :  { %650 = vmatprep.subr.mxu0 %v768_v0  ;;  %652 = vmatprep.mubr.msk.f32.mxu0 %vm769_vm0, %v768_v0  ;;  %v39_v2 = vld [vmem:[#allocation2] sm:$0xff]  ;;  %v53_v3 = vand.u32 4294901760, %v40_v1  ;;  %v770_v32 = vmov 2102212464   ;;  %v771_v34 = vmov 920167782  }
  0x27   :  { %635 = vmatprep.subr.mxu1 %v768_v0  ;;  %637 = vmatprep.mubr.msk.f32.mxu1 %vm769_vm0, %v768_v0  ;;  %v50_v4 = vsel %vm48_vm1, %v39_v2, 0  ;;  %v618_v16 = vld [vmem:[%s865_s2] ss:$0 sm:$0xff]  ;;  %v772_v38 = vmov 1326507024   ;;  %s776_s2 = smov [#allocation7]  }
  0x28   :  { %v118_v5 = vand.u32 4294901760, %v50_v4  ;;  %v130_v6 = vsub.f32 %v40_v1, %v53_v3  ;;  %651 = vmatpush3.msra.mxu0 %v53_v3  ;;  %636 = vmatpush3.msra.mxu1 %v53_v3  ;;  %v773_v40 = vmov 683565275   ;;  %v774_v42 = vmov 2475754826   ;;  %s608_s9 = sshll.u32 %s776_s2, 4  ;;  %s609_s9 = int_to_ptr.vmem [resolvable:$true] %s608_s9 }
  0x29   :  { %640 = vmatprep.subr.mxu1 %v768_v0  ;;  %655 = vmatprep.subr.mxu0 %v768_v0  ;;  %v775_v45 = vmov 2131351028   ;;  %s738_s10 = scalar_lea.vmem %s609_s9, 128  ;;  %p743_p3 = scmp.lt.s32.totalorder %s609_s9, %s609_s9 }
  0x2a   :  { %v119_v7 = vsub.f32 %v50_v4, %v118_v5  ;;  %v131_v8 = vand.u32 4294901760, %v130_v6  ;;  %p739_p2 = scmp.ne.s32.totalorder %s609_s9, %s738_s10  ;;  %p744_p4 = scmp.lt.s32.totalorder %s738_s10, %s738_s10 }
  0x2c   :  { %v120_v9 = vand.u32 4294901760, %v119_v7  ;;  %v132_v10 = vsub.f32 %v130_v6, %v131_v8  ;;  %p745_p5 = por %p744_p4, %p743_p3 }
  0x2e   :  { %653 = vmatmul.mubr.f32.vlgmr.msra.gmra.mrb[0].mxu0 %v120_v9  ;;  %v121_v11 = vsub.f32 %v119_v7, %v120_v9  ;;  %v133_v12 = vand.u32 4294901760, %v132_v10  ;;  %p746_p6 = pnand %p745_p5, %p739_p2 }
  0x2f   :  { %656 = vmatpush3.msra.mxu0 %v131_v8  ;;  %657 = vmatprep.mubr.msk.f32.mxu0 %vm769_vm0, %v768_v0 }
  0x30   :  { %v122_v13 = vand.u32 4294901760, %v121_v11  ;;  %660 = vmatprep.subr.mxu0 %v768_v0 }
  0x32   :  { %638 = vmatmul.mubr.f32.vlgmr.msra.gmra.mrb[0].mxu1 %v122_v13 }
  0x33   :  { %641 = vmatpush3.msra.mxu1 %v133_v12  ;;  %642 = vmatprep.mubr.msk.f32.mxu1 %vm769_vm0, %v768_v0 }
  0x34   :  { %645 = vmatprep.subr.mxu1 %v768_v0 }
  0x36   :  { %658 = vmatmul.mubr.f32.vlgmr.msra.gmra.mrb[0].mxu0 %v118_v5 }
  0x37   :  { %661 = vmatpush3.msra.mxu0 %v53_v3  ;;  %662 = vmatprep.mubr.msk.f32.mxu0 %vm769_vm0, %v768_v0 }
  0x3a   :  { %643 = vmatmul.mubr.f32.vlgmr.msra.gmra.mrb[0].mxu1 %v118_v5 }
  0x3b   :  { %646 = vmatpush3.msra.mxu1 %v130_v6  ;;  %647 = vmatprep.mubr.msk.f32.mxu1 %vm769_vm0, %v768_v0 }
  0x3e   :  { %663 = vmatmul.mubr.f32.vlgmr.msra.gmra.mrb[0].mxu0 %v118_v5 }
  0x42   :  { %648 = vmatmul.mubr.f32.vlgmr.msra.gmra.mrb[0].mxu1 %v119_v7 }
 0x111   :  { %v494_v14 = vpop.f32.mrb[0].mxu0 }
 0x112   :  { %v664_v15 = vpop.f32.mrb[1].mxu0 }
 0x115   :  { %v274_v17 = vpop.f32.mrb[0].mxu1 }
 0x116   :  { %v665_v18 = vadd.f32 %v618_v16, %v274_v17  ;;  %v649_v19 = vpop.f32.mrb[1].mxu1 }
 0x118   :  { %v830_v20 = vadd.f32 %v665_v18, %v494_v14 }
 0x11a   :  { %v501_v21 = vand.u32 2139095040, %v830_v20  ;;  %v498_v22 = vand.u32 2147483647, %v830_v20  ;;  %vm500_vm9 = vcmp.lt.s32.totalorder %v830_v20, 0  ;;  %vm590_vm14 = vweird.f32 %v830_v20 }
 0x11c   :  { %v502_v23 = vshrl.u32 %v501_v21, 23  ;;  %v505_v25 = vand.u32 8388607, %v498_v22  ;;  %vm499_vm10 = vcmp.le.f32.partialorder %v498_v22, 0.7853982 }
 0x11e   :  { %v619_v24 = vadd.s32 4294967169, %v502_v23  ;;  %v506_v28 = vor.u32 8388608, %v505_v25 }
 0x120   :  { %v508_v26 = vadd.s32 1, %v619_v24  ;;  %v546_v36 = vshll.u32 %v506_v28, 8 }
 0x122   :  { %vm509_vm2 = vcmp.gt.s32.totalorder %v508_v26, 0 }
 0x123   :  { %v510_v27 = vsel %vm509_vm2, %v508_v26, 0 }
 0x124   :  { %v512_v29 = vand.u32 31, %v510_v27  ;;  %v511_v30 = vshrl.u32 %v510_v27, 5 }
 0x126   :  { %v513_v31 = vsub.s32 32, %v512_v29  ;;  %v524_v33 = vshll.u32 %v770_v32, %v512_v29  ;;  %v527_v35 = vshll.u32 %v771_v34, %v512_v29  ;;  %v515_v41 = vshll.u32 %v773_v40, %v512_v29 }
 0x127   :  { %v518_v44 = vshll.u32 %v774_v42, %v512_v29  ;;  %v521_v47 = vshll.u32 %v775_v45, %v512_v29  ;;  %vm533_vm3 = vcmp.lt.s32.totalorder %v511_v30, 4  ;;  %vm530_vm4 = vcmp.lt.s32.totalorder %v511_v30, 1 }
 0x128   :  { %v525_v37 = vshrl.u32 %v771_v34, %v513_v31  ;;  %v528_v39 = vshrl.u32 %v772_v38, %v513_v31  ;;  %v516_v43 = vshrl.u32 %v774_v42, %v513_v31  ;;  %v519_v46 = vshrl.u32 %v775_v45, %v513_v31 }
 0x129   :  { %v522_v48 = vshrl.u32 %v770_v32, %v513_v31  ;;  %v514_v52 = vshrl.u32 %v773_v40, %v513_v31  ;;  %vm531_vm5 = vcmp.lt.s32.totalorder %v511_v30, 2  ;;  %vm532_vm6 = vcmp.lt.s32.totalorder %v511_v30, 3 }
 0x12a   :  { %v526_v49 = vor.u32 %v525_v37, %v524_v33  ;;  %v529_v50 = vor.u32 %v528_v39, %v527_v35  ;;  %v517_v51 = vor.u32 %v516_v43, %v515_v41  ;;  %v520_v53 = vor.u32 %v519_v46, %v518_v44 }
 0x12b   :  { %v523_v54 = vor.u32 %v522_v48, %v521_v47 }
 0x12c   :  { %v539_v55 = vsel %vm533_vm3, %v526_v49, 920167782  ;;  %v543_v56 = vsel %vm533_vm3, %v529_v50, 1326507024  ;;  %v538_v58 = vsel %vm530_vm4, %v517_v51, %v520_v53  ;;  %v534_v61 = vsel %vm530_vm4, %v514_v52, %v517_v51 }
 0x12d   :  { %v535_v57 = vsel %vm533_vm3, %v523_v54, 2102212464  ;;  %v540_v59 = vsel %vm532_vm6, %v523_v54, %v539_v55  ;;  %v542_v60 = vsel %vm530_vm4, %v520_v53, %v523_v54  ;;  %v544_v0 = vsel %vm532_vm6, %v526_v49, %v543_v56 }
 0x12e   :  { %v536_v62 = vsel %vm532_vm6, %v520_v53, %v535_v57  ;;  %v541_v63 = vsel %vm531_vm5, %v538_v58, %v540_v59  ;;  %v545_v1 = vsel %vm531_vm5, %v542_v60, %v544_v0 }
 0x12f   :  { %v836_v2 = vmul.u32.u64.low %v546_v36, %v541_v63  ;;  %v837_v3 = vmul.u32.u64.high %v546_v36, %v541_v63, %v836_v2  ;;  %v839_v4 = vmul.u32.u64.low %v546_v36, %v545_v1  ;;  %v840_v5 = vmul.u32.u64.high %v546_v36, %v545_v1, %v839_v4 }
 0x130   :  { %v537_v6 = vsel %vm531_vm5, %v534_v61, %v536_v62 }
 0x131   :  { %v556_v7 = vadd.s32 1, %v837_v3  ;;  %v553_v8 = vmul.u32 %v546_v36, %v537_v6  ;;  %vm555_vm7 = vc.u32 %v840_v5, %v836_v2  ;;  %v554_v21 = vadd.s32 %v836_v2, %v840_v5 }
 0x133   :  { %v557_v9 = vsel %vm555_vm7, %v556_v7, %v837_v3 }
 0x134   :  { %v558_v10 = vadd.s32 %v557_v9, %v553_v8 }
 0x136   :  { %v559_v11 = vadd.s32 536870912, %v558_v10 }
 0x138   :  { %v560_v12 = vshrl.u32 %v559_v11, 30 }
 0x13a   :  { %v561_v13 = vshll.u32 %v560_v12, 30  ;;  %v584_v36 = vsub.s32 4, %v560_v12 }
 0x13c   :  { %v562_v14 = vsub.s32 %v558_v10, %v561_v13  ;;  %v585_v38 = vsel %vm500_vm9, %v584_v36, %v560_v12 }
 0x13d   :  { %v587_v39 = vsel %vm499_vm10, 0, %v585_v38 }
 0x13e   :  { %v564_v15 = vsub.s32 0, %v562_v14  ;;  %v591_v40 = vand.u32 3, %v587_v39 }
 0x140   :  { %v620_v16 = vmin.u32 %v564_v15, %v562_v14  ;;  %vm596_vm11 = vcmp.eq.s32.totalorder %v591_v40, 2  ;;  %vm593_vm12 = vcmp.eq.s32.totalorder %v591_v40, 0  ;;  %vm592_vm13 = vcmp.lt.s32.totalorder %v591_v40, 2 }
 0x142   :  { %v566_v17 = vclz %v620_v16 }
 0x144   :  { %v621_v18 = vadd.s32 4294967294, %v566_v17 }
 0x146   :  { %vm622_vm8 = vcmp.lt.s32.totalorder %v621_v18, 0 }
 0x147   :  { %v569_v19 = vsel %vm622_vm8, 0, %v621_v18 }
 0x148   :  { %v570_v23 = vsub.s32 32, %v569_v19  ;;  %v574_v24 = vsub.s32 4294967266, %v569_v19  ;;  %v571_v25 = vshll.u32 %v562_v14, %v569_v19 }
 0x14a   :  { %v572_v26 = vshrl.u32 %v554_v21, %v570_v23  ;;  %v575_v27 = vadd.s32 127, %v574_v24 }
 0x14c   :  { %v573_v28 = vor.u32 %v572_v26, %v571_v25  ;;  %v576_v29 = vshll.u32 %v575_v27, 23 }
 0x14e   :  { %v577_v30 = vor.u32 4788187, %v576_v29  ;;  %v580_v32 = vcvt.s32.f32 %v573_v28 }
 0x150   :  { %v578_v31 = vand.u32 2147483647, %v577_v30 }
 0x152   :  { %v581_v33 = vmul.f32 %v580_v32, %v578_v31 }
 0x154   :  { %v582_v34 = vxor.u32 2147483648, %v581_v33 }
 0x156   :  { %v583_v35 = vsel %vm500_vm9, %v582_v34, %v581_v33 }
 0x157   :  { %v586_v37 = vsel %vm499_vm10, %v830_v20, %v583_v35 }
 0x158   :  { %690 = vcosq.f32 %v586_v37 }
 0x159   :  { %692 = vsinq.f32 %v586_v37 }
 0x162   :  { %v691_v41 = vpop.eup %690 }
 0x163   :  { %v693_v42 = vpop.eup %692  ;;  %v597_v43 = vxor.u32 2147483648, %v691_v41 }
 0x164   :  { %v594_v44 = vxor.u32 2147483648, %v693_v42 }
 0x165   :  { %v598_v45 = vsel %vm596_vm11, %v597_v43, %v693_v42 }
 0x166   :  { %v595_v22 = vsel %vm593_vm12, %v691_v41, %v594_v44 }
 0x167   :  { %v599_v46 = vsel %vm592_vm13, %v595_v22, %v598_v45 }
 0x168   :  { %v600_v47 = vsel %vm590_vm14, nan, %v599_v46 }
 0x169   :  { %601 = vst [vmem:[#allocation7] sm:$0xff] %v600_v47 }
 0x16a   :  { %749 = shalt.err (!%p746_p6)
}
 0x16b   :  { %s750_s13 = scalar_lea.hbm %s866_s3, 128 }
 0x16c   :  { %p751_p7 = scmp.ne.s32.totalorder %s866_s3, %s750_s13  ;;  %p754_p8 = scmp.lt.u32.totalorder %s750_s13, %s866_s3 }
 0x16e   :  { %p756_p9 = pnand %p754_p8, %p751_p7 }
 0x170   :  { %759 = shalt.err (!%p756_p9)
}
 0x171   :  { %611 = dma.vmem_to_hbm [thread:$0]  %s609_s9, 128, %s866_s3, [#allocation4]  }
 0x172   :  { %764 = dma.done.wait [#allocation4], 128  }
 0x173   :  { %765 = vsyncadd [#allocation4], 4294967168 }
 0x174   :  { %615 = vsyncpa [#allocation3], 1 }
 0x175   :  { %616 = vsyncpa [#allocation6], 1 }
 0x176   :  { %617 = vsyncpa [#allocation4], 1 }

</bundles_post_ra>
